<compile_context>
chip_gen: v5e
topology: v5e:2x2
jax: 0.10.0
libtpu: 0.0.40
codegen_flags: <defaults>
</compile_context>

<pallas_src>
import functools
import math

import jax
import jax.numpy as jnp
from jax.experimental import pallas as pl
from jax.experimental.pallas import tpu as pltpu

_MIB = 1024 * 1024


def _h_sigmoid_kernel(x_ref, o_ref, *, scale):
    x = x_ref[...]
    # ReLU6(x + 3) * (h_max / 6); constants are weakly typed -> stays in x dtype.
    o_ref[...] = (jnp.clip(x + 3.0, 0.0, 6.0) * scale).astype(o_ref.dtype)


def _h_sigmoid_jnp(x, scale):
    return (jnp.clip(x + 3.0, 0.0, 6.0) * scale).astype(x.dtype)


def _vmem_capacity_bytes() -> int:
    """Physical per-core VMEM, with a conservative fallback (v7x = 64 MiB)."""
    try:
        info = pltpu.get_tpu_info()
        cap = getattr(info, "vmem_capacity_bytes", None)
        if cap:
            return int(cap)
    except Exception:
        pass
    return 64 * _MIB


def _pick_lane(total: int) -> int:
    """Widest lane width (multiple of 128) that divides `total`, else 0."""
    for cand in (8192, 4096, 2048, 1024, 512, 256, 128):
        if total % cand == 0:
            return cand
    return 0


def _round_up(v: int, m: int) -> int:
    return ((v + m - 1) // m) * m


def _run_2d(x2, scale, block_bytes, donate_input):
    """Run the elementwise kernel over a lane-dense (rows, lane) view."""
    rows, lane = x2.shape
    dtype = x2.dtype
    itemsize = jnp.dtype(dtype).itemsize

    # dtype-aware sublane alignment: (8,128) f32, (16,128) bf16, (32,128) int8/fp8.
    align = max(8, 32 // max(1, itemsize))

    # Target ~block_bytes per tile, rounded down to the packed sublane tiling.
    tm = max(align, block_bytes // (lane * itemsize))
    tm = max(align, (tm // align) * align)

    # Guarantee >=2 grid steps whenever the rows allow it, so the "parallel"
    # grid axis shards across both of v7x's TensorCores (no-op on v5e/v6e).
    if rows > align:
        tm = min(tm, max(align, _round_up(pl.cdiv(rows, 2), align)))
    tm = min(tm, rows)
    grid = (pl.cdiv(rows, tm),)  # ragged last block handled by Pallas

    # Explicit VMEM budget: 2 arrays x 2 pipeline buffers x tile + headroom,
    # floored at 16 MiB, never above 3/4 of physical VMEM (v7x only has 64 MiB).
    tile_bytes = tm * lane * itemsize
    vmem_cap = _vmem_capacity_bytes()
    vmem_limit = min(int(vmem_cap * 3 // 4),
                     max(16 * _MIB, 4 * tile_bytes + 8 * _MIB))

    n = rows * lane
    cost = pl.CostEstimate(flops=4 * n, transcendentals=0,
                           bytes_accessed=2 * n * itemsize)

    kernel = functools.partial(_h_sigmoid_kernel, scale=scale)
    return pl.pallas_call(
        kernel,
        out_shape=jax.ShapeDtypeStruct(x2.shape, dtype),
        grid=grid,
        in_specs=[pl.BlockSpec((tm, lane), lambda i: (i, 0))],
        out_specs=pl.BlockSpec((tm, lane), lambda i: (i, 0)),
        compiler_params=pltpu.CompilerParams(
            dimension_semantics=("parallel",),
            vmem_limit_bytes=vmem_limit,
        ),
        cost_estimate=cost,
        input_output_aliases=({0: 0} if donate_input else {}),
    )(x2)


def h_sigmoid(x, h_max: float = 1.0, block_bytes: int | None = None,
              donate_input: bool = False):
    """Applies hard-sigmoid elementwise. Works for any shape/dtype."""
    scale = h_max / 6.0
    orig_shape = x.shape
    total = math.prod(orig_shape) if orig_shape else 1

    if block_bytes is None:
        # Generation-aware default: 8 MiB tiles (32 MiB double-buffered footprint)
        # on v5e/v6e/v7x; scales down automatically on tighter VMEM budgets.
        block_bytes = max(_MIB, min(8 * _MIB, _vmem_capacity_bytes() // 8))

    # --- Lane-dense flattening (no padding when 128 divides the flat size) ---
    lane = _pick_lane(total)
    if lane:
        out2 = _run_2d(x.reshape(-1, lane), scale, block_bytes, donate_input)
        return out2.reshape(orig_shape)

    # --- Ragged flat size: kernel on the 128-aligned bulk, jnp on the tiny
    # (<128-element) tail. No full-array pad / trailing-slice copies.
    flat = x.reshape(-1)
    bulk_len = (total // 128) * 128
    if bulk_len == 0:
        # Smaller than one vreg row; a kernel launch is pure overhead.
        return _h_sigmoid_jnp(x, scale)
    bulk_lane = _pick_lane(bulk_len)
    bulk_out = _run_2d(flat[:bulk_len].reshape(-1, bulk_lane), scale,
                       block_bytes, False).reshape(-1)
    tail_out = _h_sigmoid_jnp(flat[bulk_len:], scale)
    return jnp.concatenate([bulk_out, tail_out]).reshape(orig_shape)


def h_sigmoid_ref(x, h_max: float = 1.0):
    return jnp.clip(x + 3.0, 0.0, 6.0) * (h_max / 6.0)


if __name__ == "__main__":
    key = jax.random.PRNGKey(0)

    # NCHW input consistent with a typical conv activation.
    x = jax.random.normal(key, (2, 4, 16, 16), dtype=jnp.float32) * 4.0
    y = jax.block_until_ready(h_sigmoid(x, h_max=1.0))
    y_ref = h_sigmoid_ref(x, h_max=1.0)
    assert y.shape == x.shape and y.dtype == x.dtype
    assert jnp.allclose(y, y_ref, atol=1e-6, rtol=1e-6)

    # Ragged shape (flat size not a multiple of 128) exercises the bulk+tail path.
    x2 = jax.random.normal(jax.random.PRNGKey(1), (3, 5, 7, 11),
                           dtype=jnp.float32) * 4.0
    y2 = jax.block_until_ready(h_sigmoid(x2, h_max=1.0))
    assert jnp.allclose(y2, h_sigmoid_ref(x2, h_max=1.0), atol=1e-6, rtol=1e-6)

    # bf16 path (compute stays in bf16; looser tolerance vs f32 reference).
    xb = (jax.random.normal(jax.random.PRNGKey(2), (2, 4, 16, 16),
                            dtype=jnp.float32) * 4.0).astype(jnp.bfloat16)
    yb = jax.block_until_ready(h_sigmoid(xb, h_max=1.0))
    assert yb.dtype == jnp.bfloat16
    assert jnp.allclose(yb.astype(jnp.float32),
                        h_sigmoid_ref(xb.astype(jnp.float32), h_max=1.0),
                        atol=1e-2, rtol=1e-2)

    # Larger multi-block shape to exercise the >=2-grid-step / alignment path.
    x3 = jax.random.normal(jax.random.PRNGKey(3), (8, 32, 32, 32),
                           dtype=jnp.float32)
    y3 = jax.block_until_ready(h_sigmoid(x3, h_max=1.0))
    assert jnp.allclose(y3, h_sigmoid_ref(x3, h_max=1.0), atol=1e-6, rtol=1e-6)

    print("KERNEL_OK")
</pallas_src>

<mosaic_0001>
module attributes {stable_mosaic.version = 11 : i64} {
  func.func @_h_sigmoid_kernel(%arg0: i32, %arg1: memref<1x2048xf32, #tpu.memory_space<vmem>>, %arg2: memref<1x2048xf32, #tpu.memory_space<vmem>>) attributes {dimension_semantics = [#tpu.dimension_semantics<parallel>], iteration_bounds = array<i64: 1>, scalar_prefetch = 0 : i64, scratch_operands = 0 : i64, tpu.core_type = #tpu.core_type<tc>, window_params = [{transform_indices = @transform_0, window_bounds = array<i64: 1, 2048>}, {transform_indices = @transform_1, window_bounds = array<i64: 1, 2048>}]} {
    %c0 = arith.constant 0 : index
    %c0_0 = arith.constant 0 : index
    %0 = vector.load %arg1[%c0, %c0_0] : memref<1x2048xf32, #tpu.memory_space<vmem>>, vector<1x2048xf32>
    %cst = arith.constant 3.000000e+00 : f32
    %1 = vector.broadcast %cst : f32 to vector<1x2048xf32>
    %2 = arith.addf %0, %1 : vector<1x2048xf32>
    %cst_1 = arith.constant 0.000000e+00 : f32
    %cst_2 = arith.constant 6.000000e+00 : f32
    %3 = vector.broadcast %cst_1 : f32 to vector<1x2048xf32>
    %4 = arith.maximumf %3, %2 : vector<1x2048xf32>
    %5 = vector.broadcast %cst_2 : f32 to vector<1x2048xf32>
    %6 = arith.minimumf %5, %4 : vector<1x2048xf32>
    %cst_3 = arith.constant 0.166666672 : f32
    %7 = vector.broadcast %cst_3 : f32 to vector<1x2048xf32>
    %8 = arith.mulf %6, %7 : vector<1x2048xf32>
    %c0_4 = arith.constant 0 : index
    %c0_5 = arith.constant 0 : index
    %9 = vector.load %arg2[%c0_4, %c0_5] : memref<1x2048xf32, #tpu.memory_space<vmem>>, vector<1x2048xf32>
    tpu.vector_store %arg2[%c0_4, %c0_5], %8 {strides = array<i32>} : memref<1x2048xf32, #tpu.memory_space<vmem>>, vector<1x2048xf32>,
    return
  }
  func.func @transform_0(%arg0: i32) -> (i32, i32) {
    %c0_i32 = arith.constant 0 : i32
    %c0_i32_0 = arith.constant 0 : i32
    return %arg0, %c0_i32 : i32, i32
  }
  func.func @transform_1(%arg0: i32) -> (i32, i32) {
    %c0_i32 = arith.constant 0 : i32
    %c0_i32_0 = arith.constant 0 : i32
    return %arg0, %c0_i32 : i32, i32
  }
}

</mosaic_0001>

<bundles_post_ra>
// kernel: tpu_custom_call.1
= control target key start
LH: loop header
LB: loop body
LE: loop exit
PB: predicated region body
PF: predicated region fallthrough
CT: control target
= control target key end

     0   :  { %6 = vsyncpa [#allocation3], 0  ;;  %s124_s0 = inlined_call_operand.hbm [shape: f32[1,2048], index: 0, kind: input, shape index: {}]   ;;  %s125_s1 = inlined_call_operand.hbm [shape: f32[1,2048], index: 1, kind: output, shape index: {}]  }
   0x1   :  { %7 = vsyncpa [#allocation4], 0  ;;  %s13_s8 = sshll.u32 %s124_s0, 4  ;;  %s106_s9 = smov [#allocation2]   ;;  %s14_s8 = int_to_ptr.hbm [resolvable:$true] %s13_s8 }
   0x2   :  { %s15_s10 = sshll.u32 %s106_s9, 4  ;;  %s16_s10 = int_to_ptr.vmem [resolvable:$true] %s15_s10 }
   0x3   :  { %18 = dma.hbm_to_vmem [thread:$0]  %s14_s8, 256, %s16_s10, [#allocation3]  }
   0x4   :  { %102 = dma.done.wait [#allocation3], 256  }
   0x5   :  { %103 = vsyncadd [#allocation3], 4294967040  ;;  %v23_v0 = vld [vmem:[#allocation2] sm:$0xff]  ;;  %v24_v1 = vld [vmem:[#allocation2 + $0x8] sm:$0xff]  ;;  %s107_s11 = smov [#allocation5]   ;;  %s42_s0 = sshll.u32 %s125_s1, 4  ;;  %s43_s0 = int_to_ptr.hbm [resolvable:$true] %s42_s0 }
   0x6   :  { %v25_v2 = vadd.f32 3.0, %v23_v0  ;;  %v26_v3 = vadd.f32 3.0, %v24_v1  ;;  %s40_s12 = sshll.u32 %s107_s11, 4  ;;  %s41_s12 = int_to_ptr.vmem [resolvable:$true] %s40_s12 }
   0x8   :  { %v27_v4 = vmax.f32 %v25_v2, 0.0  ;;  %v28_v5 = vmax.f32 %v26_v3, 0.0 }
   0xa   :  { %v29_v6 = vmin.f32 %v27_v4, 6.0  ;;  %v30_v7 = vmin.f32 %v28_v5, 6.0 }
   0xc   :  { %v31_v8 = vmul.f32 0.16666667, %v29_v6  ;;  %v32_v9 = vmul.f32 0.16666667, %v30_v7 }
   0xe   :  { %33 = vst [vmem:[#allocation5] sm:$0xff] %v31_v8 }
   0xf   :  { %34 = vst [vmem:[#allocation5 + $0x8] sm:$0xff] %v32_v9 }
  0x10   :  { %45 = dma.vmem_to_hbm [thread:$0]  %s41_s12, 256, %s43_s0, [#allocation4]  }
  0x11   :  { %104 = dma.done.wait [#allocation4], 256  }
  0x12   :  { %105 = vsyncadd [#allocation4], 4294967040 }
  0x13   :  { %50 = vsyncpa [#allocation3], 1 }
  0x14   :  { %51 = vsyncpa [#allocation4], 1 }

</bundles_post_ra>
